<compile_context>
chip_gen: v7x
topology: tpu7x:2x2x1
jax: 0.10.0
libtpu: 0.0.40
codegen_flags: <defaults>
</compile_context>

<pallas_src>
import functools

import jax
import jax.numpy as jnp
from jax.experimental import pallas as pl
from jax.experimental.pallas import tpu as pltpu

Z_MAX = 10                      # supported atom types for the synthetic embedding table
Z_PAD = 16                      # sublane-padded embedding-table rows (one-hot width)
LANE = 128                      # TPU lane width
_VMEM_LIMIT = 32 * 1024 * 1024  # safe scoped-VMEM budget on v5e / v6e / v7x


def _round_up(x, m):
    return ((x + m - 1) // m) * m


# ----------------------------------------------------------------------------
# Fused kernel: node embedding (stand-in base model) + 'sum' readout.
# Grid: (D column blocks ["parallel"], atom tiles ["arbitrary" reduction]).
# Per step:
#   h                = SiLU(pos @ Wp[:,d] + one_hot(z) @ Wz[:,d] + b[:,d])   (MXU+EUP)
#   emb[a, d]        = bf16(h)                                               (written once)
#   graph[:, d]     += one_hot(bid)^T @ h                                    (segment sum, MXU)
# The graph output block index is constant along the atom axis -> resident
# accumulator; no scratch buffer, no finalize copy.
# ----------------------------------------------------------------------------
def fused_embed_readout_kernel(z_ref, pos_ref, bid_ref, wz_ref, wp_ref, b_ref,
                               emb_ref, graph_ref):
    a_step = pl.program_id(1)
    tile = z_ref.shape[0]
    b_pad = graph_ref.shape[0]

    # ---- node embedding: both contractions on the MXU (VALU stays free) ----
    z = z_ref[...]                                                      # [T, 1] int32
    onehot = (z == jax.lax.broadcasted_iota(jnp.int32, (tile, Z_PAD), 1)
              ).astype(jnp.float32)                                     # [T, 16]
    h = jnp.dot(pos_ref[...], wp_ref[...], preferred_element_type=jnp.float32)
    h = h + jnp.dot(onehot, wz_ref[...], preferred_element_type=jnp.float32)
    h = h + b_ref[...]
    h = h * jax.nn.sigmoid(h)                                           # SiLU (EUP)
    emb_ref[...] = h.astype(emb_ref.dtype)                              # bf16 HBM stream

    # ---- fused 'sum' readout: accumulate straight into the resident output ----
    @pl.when(a_step == 0)
    def _init():
        graph_ref[...] = jnp.zeros_like(graph_ref)

    # one_hot(batch)^T built directly in [B_pad, T] orientation (atoms on lanes)
    sel = (bid_ref[...] == jax.lax.broadcasted_iota(
        jnp.int32, (b_pad, tile), 0)).astype(jnp.float32)               # [B_pad, T]
    graph_ref[...] += jnp.dot(sel, h, preferred_element_type=jnp.float32)


# ----------------------------------------------------------------------------
# PredictionMLP: pred = ReLU(graph @ W1 + b1) @ W2 + b2  (tiny, single step).
# Outputs are lane-dense ([B_pad, OUT_PAD]); the wrapper slices real rows/cols.
# ----------------------------------------------------------------------------
def prediction_mlp_kernel(graph_ref, w1_ref, b1_ref, w2_ref, b2_ref, pred_ref):
    h = jnp.dot(graph_ref[...], w1_ref[...],
                preferred_element_type=jnp.float32) + b1_ref[...]
    h = jnp.maximum(h, 0.0)                                             # ReLU
    p = jnp.dot(h, w2_ref[...], preferred_element_type=jnp.float32) + b2_ref[...]
    pred_ref[...] = p.astype(pred_ref.dtype)


# ----------------------------------------------------------------------------
# JAX glue
# ----------------------------------------------------------------------------
def to_dense_batch_jax(x, batch, batch_size, max_num_atoms):
    """torch_geometric.utils.to_dense_batch (fill_value=0), gather formulation.

    Assumes `batch` is sorted ascending (standard torch_geometric contract).
    Atoms whose within-graph position exceeds max_num_atoms are dropped, as in
    torch_geometric truncation.
    """
    # TODO(synk): the data-dependent dense batching has no clean Pallas
    # equivalent; kept as a single O(N) XLA gather (no scatter, no N^2 matrix).
    n = x.shape[0]
    counts = jnp.bincount(batch, length=batch_size)
    starts = (jnp.cumsum(counts) - counts).astype(jnp.int32)            # exclusive cumsum
    j = jnp.arange(max_num_atoms, dtype=jnp.int32)
    idx = starts[:, None] + j[None, :]                                  # [B, A]
    idx = jnp.where(j[None, :] < counts[:, None], idx, n)               # sentinel -> fill
    return jnp.take(x, idx, axis=0, mode="fill", fill_value=0)          # [B, A, D]


def init_params(node_dim, output_dim, key):
    k = jax.random.split(key, 5)
    s = 0.1
    return {
        "wz": s * jax.random.normal(k[0], (Z_MAX, node_dim), jnp.float32),
        "wp": s * jax.random.normal(k[1], (9, node_dim), jnp.float32),
        "b": s * jax.random.normal(k[2], (1, node_dim), jnp.float32),
        "w1": s * jax.random.normal(k[3], (node_dim, node_dim), jnp.float32),
        "b1": jnp.zeros((1, node_dim), jnp.float32),
        "w2": s * jax.random.normal(k[4], (node_dim, output_dim), jnp.float32),
        "b2": jnp.zeros((1, output_dim), jnp.float32),
    }


def molecule_prediction_forward(params, pos0, pos1, pos2, atom_z, batch_mapping,
                                *, batch_size, max_num_atoms, node_dim, output_dim,
                                tile_n=1024):
    if node_dim % LANE:
        raise ValueError("node_dim must be a multiple of 128 for lane-dense tiles")
    n = atom_z.shape[0]
    d = node_dim

    # D column blocking: 256-wide blocks keep the v6e/v7x MXU full-width and give
    # the leading "parallel" axis >1 step (2-TC sharding on v7x) at larger node_dim.
    if d <= 256:
        d_blk = d
    elif d % 256 == 0:
        d_blk = 256
    else:
        d_blk = LANE
    n_d = d // d_blk

    # ---- wrapper-side layout plumbing ----
    tile = _round_up(min(tile_n, max(n, 1)), LANE)           # lane-aligned atom tile
    n_pad = _round_up(n, tile)
    b_pad = _round_up(batch_size, 8)                         # >= 8 sublanes for the MLP
    out_pad = _round_up(output_dim, LANE)                    # lane-dense prediction slab
    pad_rows = n_pad - n

    pos_feat = jnp.concatenate([pos0, pos1, pos2], axis=-1).astype(jnp.float32)
    pos_feat = jnp.pad(pos_feat, ((0, pad_rows), (0, 0)))
    # clamp z to the table range (matches the reference gather's clamping semantics)
    z_col = jnp.clip(atom_z.astype(jnp.int32), 0, Z_MAX - 1)
    z_col = jnp.pad(z_col, (0, pad_rows)).reshape(n_pad, 1)
    # padding atoms get graph id == batch_size so they never land in a real graph row
    bid_row = jnp.pad(batch_mapping.astype(jnp.int32), (0, pad_rows),
                      constant_values=batch_size).reshape(1, n_pad)

    wzp = jnp.pad(params["wz"], ((0, Z_PAD - Z_MAX), (0, 0)))          # [16, D]
    w2p = jnp.pad(params["w2"], ((0, 0), (0, out_pad - output_dim)))
    b2p = jnp.pad(params["b2"], ((0, 0), (0, out_pad - output_dim)))

    grid = (n_d, n_pad // tile)

    # ---- fused kernel: node embeddings + segment-sum readout ----
    ce = pl.CostEstimate(
        flops=n_pad * d * (2 * 9 + 2 * Z_PAD + 6) + 2 * n_pad * b_pad * d,
        transcendentals=n_pad * d,
        bytes_accessed=(4 * n_d * n_pad * 11                 # z + pos + bid (per D block)
                        + 4 * d * (Z_PAD + 9 + 1)            # weights
                        + 2 * n_pad * d                      # bf16 embedding write
                        + 4 * b_pad * d),                    # graph accumulator write
    )
    node_emb_pad, graph_pad = pl.pallas_call(
        fused_embed_readout_kernel,
        out_shape=(
            jax.ShapeDtypeStruct((n_pad, d), jnp.bfloat16),   # node-embedding slab (bf16)
            jax.ShapeDtypeStruct((b_pad, d), jnp.float32),    # per-graph sum readout
        ),
        grid=grid,
        in_specs=[
            pl.BlockSpec((tile, 1), lambda dj, ai: (ai, 0)),        # z (int32)
            pl.BlockSpec((tile, 9), lambda dj, ai: (ai, 0)),        # geometric features
            pl.BlockSpec((1, tile), lambda dj, ai: (0, ai)),        # batch ids (lanes)
            pl.BlockSpec((Z_PAD, d_blk), lambda dj, ai: (0, dj)),   # Wz (padded table)
            pl.BlockSpec((9, d_blk), lambda dj, ai: (0, dj)),       # Wp
            pl.BlockSpec((1, d_blk), lambda dj, ai: (0, dj)),       # b
        ],
        out_specs=(
            pl.BlockSpec((tile, d_blk), lambda dj, ai: (ai, dj)),   # node embeddings
            pl.BlockSpec((b_pad, d_blk), lambda dj, ai: (0, dj)),   # graph sums (resident)
        ),
        compiler_params=pltpu.CompilerParams(
            dimension_semantics=("parallel", "arbitrary"),
            vmem_limit_bytes=_VMEM_LIMIT),
        cost_estimate=ce,
    )(z_col, pos_feat, bid_row, wzp, params["wp"], params["b"])

    # ---- to_dense_batch (O(N) gather; returned output, never re-read by kernels) ----
    node_dense = to_dense_batch_jax(
        node_emb_pad[:n], batch_mapping.astype(jnp.int32),
        batch_size, max_num_atoms).astype(jnp.float32)

    # ---- PredictionMLP: tiny [B_pad, D] problem, single-step pallas_call ----
    pred_pad = pl.pallas_call(
        prediction_mlp_kernel,
        out_shape=jax.ShapeDtypeStruct((b_pad, out_pad), jnp.float32),
        compiler_params=pltpu.CompilerParams(vmem_limit_bytes=_VMEM_LIMIT),
    )(graph_pad, params["w1"], params["b1"], w2p, b2p)

    graph_embeddings = graph_pad[:batch_size]
    predictions = pred_pad[:batch_size, :output_dim].reshape(-1)   # torch.flatten
    return node_dense, graph_embeddings, predictions


# ----------------------------------------------------------------------------
# Pure-JAX reference of the same forward (structural sanity check)
# ----------------------------------------------------------------------------
def reference_forward(params, pos0, pos1, pos2, atom_z, batch, *,
                      batch_size, max_num_atoms):
    pos_feat = jnp.concatenate([pos0, pos1, pos2], axis=-1)
    h = params["wz"][atom_z] + pos_feat @ params["wp"] + params["b"]
    node = h * jax.nn.sigmoid(h)
    dense = to_dense_batch_jax(node, batch.astype(jnp.int32), batch_size, max_num_atoms)
    graph = jax.ops.segment_sum(node, batch, num_segments=batch_size)
    h1 = jnp.maximum(graph @ params["w1"] + params["b1"], 0.0)
    pred = (h1 @ params["w2"] + params["b2"]).reshape(-1)
    return dense, graph, pred


if __name__ == "__main__":
    key = jax.random.PRNGKey(0)
    kz, kp0, kp1, kp2, kw = jax.random.split(key, 5)

    GRAPH_SIZES = (60, 50, 40)          # 3 molecules
    N_ATOMS = sum(GRAPH_SIZES)          # 150 atoms total
    BATCH = len(GRAPH_SIZES)
    MAX_NUM_ATOMS = 64
    NODE_DIM = 128                      # module default node_dim=128 (lane-dense)
    OUTPUT_DIM = 1

    atom_z = jax.random.randint(kz, (N_ATOMS,), 1, Z_MAX, dtype=jnp.int32)
    pos0 = jax.random.normal(kp0, (N_ATOMS, 3), jnp.float32)
    pos1 = jax.random.normal(kp1, (N_ATOMS, 3), jnp.float32)
    pos2 = jax.random.normal(kp2, (N_ATOMS, 3), jnp.float32)
    batch_mapping = jnp.concatenate(
        [jnp.full((sz,), g, jnp.int32) for g, sz in enumerate(GRAPH_SIZES)])

    params = init_params(NODE_DIM, OUTPUT_DIM, kw)

    fwd = jax.jit(functools.partial(
        molecule_prediction_forward,
        batch_size=BATCH, max_num_atoms=MAX_NUM_ATOMS,
        node_dim=NODE_DIM, output_dim=OUTPUT_DIM,
        tile_n=128))     # small tile so the demo exercises a multi-step reduction grid

    node_dense, graph_emb, preds = fwd(params, pos0, pos1, pos2, atom_z, batch_mapping)
    jax.block_until_ready((node_dense, graph_emb, preds))

    assert node_dense.shape == (BATCH, MAX_NUM_ATOMS, NODE_DIM)
    assert graph_emb.shape == (BATCH, NODE_DIM)
    assert preds.shape == (BATCH * OUTPUT_DIM,)

    dense_r, graph_r, pred_r = reference_forward(
        params, pos0, pos1, pos2, atom_z, batch_mapping,
        batch_size=BATCH, max_num_atoms=MAX_NUM_ATOMS)
    assert jnp.allclose(node_dense, dense_r, atol=5e-2, rtol=5e-2)   # bf16 node stream
    assert jnp.allclose(graph_emb, graph_r, atol=2e-2, rtol=2e-2)    # f32 accumulation
    assert jnp.allclose(preds, pred_r, atol=2e-2, rtol=2e-2)

    print("KERNEL_OK")
</pallas_src>

<mosaic_0001>
module attributes {stable_mosaic.version = 11 : i64} {
  func.func @fused_embed_readout_kernel(%arg0: i32, %arg1: i32, %arg2: memref<128x1xi32, #tpu.memory_space<vmem>>, %arg3: memref<128x9xf32, #tpu.memory_space<vmem>>, %arg4: memref<1x128xi32, #tpu.memory_space<vmem>>, %arg5: memref<16x128xf32, #tpu.memory_space<vmem>>, %arg6: memref<9x128xf32, #tpu.memory_space<vmem>>, %arg7: memref<1x128xf32, #tpu.memory_space<vmem>>, %arg8: memref<128x128xbf16, #tpu.memory_space<vmem>>, %arg9: memref<8x128xf32, #tpu.memory_space<vmem>>) attributes {dimension_semantics = [#tpu.dimension_semantics<parallel>, #tpu.dimension_semantics<arbitrary>], iteration_bounds = array<i64: 1, 2>, scalar_prefetch = 0 : i64, scratch_operands = 0 : i64, tpu.core_type = #tpu.core_type<tc>, window_params = [{transform_indices = @transform_0, window_bounds = array<i64: 128, 1>}, {transform_indices = @transform_1, window_bounds = array<i64: 128, 9>}, {transform_indices = @transform_2, window_bounds = array<i64: 1, 128>}, {transform_indices = @transform_3, window_bounds = array<i64: 16, 128>}, {transform_indices = @transform_4, window_bounds = array<i64: 9, 128>}, {transform_indices = @transform_5, window_bounds = array<i64: 1, 128>}, {transform_indices = @transform_6, window_bounds = array<i64: 128, 128>}, {transform_indices = @transform_7, window_bounds = array<i64: 8, 128>}]} {
    %c0 = arith.constant 0 : index
    %c0_0 = arith.constant 0 : index
    %0 = vector.load %arg2[%c0, %c0_0] : memref<128x1xi32, #tpu.memory_space<vmem>>, vector<128x1xi32>
    %1 = tpu.iota {dimensions = array<i32: 1>} : vector<128x16xi32>
    %2 = vector.broadcast %0 : vector<128x1xi32> to vector<128x16xi32>
    %3 = arith.cmpi eq, %2, %1 : vector<128x16xi32>
    %4 = arith.extui %3 : vector<128x16xi1> to vector<128x16xi32>
    %5 = arith.sitofp %4 : vector<128x16xi32> to vector<128x16xf32>
    %c0_1 = arith.constant 0 : index
    %c0_2 = arith.constant 0 : index
    %6 = vector.load %arg3[%c0_1, %c0_2] : memref<128x9xf32, #tpu.memory_space<vmem>>, vector<128x9xf32>
    %c0_3 = arith.constant 0 : index
    %c0_4 = arith.constant 0 : index
    %7 = vector.load %arg6[%c0_3, %c0_4] : memref<9x128xf32, #tpu.memory_space<vmem>>, vector<9x128xf32>
    %cst = arith.constant dense<0.000000e+00> : vector<128x128xf32>
    %8 = tpu.matmul %6, %7, %cst {dimension_numbers = #tpu.dot_dimension_numbers<[1], [0], [0], [1], [0, 0, 1, 1], [], []>} : vector<128x9xf32>, vector<9x128xf32>, vector<128x128xf32> -> vector<128x128xf32>
    %c0_5 = arith.constant 0 : index
    %c0_6 = arith.constant 0 : index
    %9 = vector.load %arg5[%c0_5, %c0_6] : memref<16x128xf32, #tpu.memory_space<vmem>>, vector<16x128xf32>
    %cst_7 = arith.constant dense<0.000000e+00> : vector<128x128xf32>
    %10 = tpu.matmul %5, %9, %cst_7 {dimension_numbers = #tpu.dot_dimension_numbers<[1], [0], [0], [1], [0, 0, 1, 1], [], []>} : vector<128x16xf32>, vector<16x128xf32>, vector<128x128xf32> -> vector<128x128xf32>
    %11 = arith.addf %8, %10 : vector<128x128xf32>
    %c0_8 = arith.constant 0 : index
    %c0_9 = arith.constant 0 : index
    %12 = vector.load %arg7[%c0_8, %c0_9] : memref<1x128xf32, #tpu.memory_space<vmem>>, vector<1x128xf32>
    %13 = vector.broadcast %12 : vector<1x128xf32> to vector<128x128xf32>
    %14 = arith.addf %11, %13 : vector<128x128xf32>
    %15 = arith.negf %14 : vector<128x128xf32>
    %16 = math.exp %15 : vector<128x128xf32>
    %cst_10 = arith.constant 1.000000e+00 : f32
    %17 = vector.broadcast %cst_10 : f32 to vector<128x128xf32>
    %18 = arith.addf %17, %16 : vector<128x128xf32>
    %19 = arith.divf %17, %18 : vector<128x128xf32>
    %20 = arith.mulf %14, %19 : vector<128x128xf32>
    %21 = arith.truncf %20 : vector<128x128xf32> to vector<128x128xbf16>
    %c0_11 = arith.constant 0 : index
    %c0_12 = arith.constant 0 : index
    %22 = vector.load %arg8[%c0_11, %c0_12] : memref<128x128xbf16, #tpu.memory_space<vmem>>, vector<128x128xbf16>
    tpu.vector_store %arg8[%c0_11, %c0_12], %21 {strides = array<i32>} : memref<128x128xbf16, #tpu.memory_space<vmem>>, vector<128x128xbf16>,
    %c0_i32 = arith.constant 0 : i32
    %23 = arith.cmpi eq, %arg1, %c0_i32 : i32
    %24 = arith.extui %23 : i1 to i32
    %c0_i32_13 = arith.constant 0 : i32
    %25 = arith.cmpi ne, %24, %c0_i32_13 : i32
    scf.if %25 {
      %cst_21 = arith.constant 0.000000e+00 : f32
      %36 = vector.broadcast %cst_21 : f32 to vector<8x128xf32>
      %c0_22 = arith.constant 0 : index
      %c0_23 = arith.constant 0 : index
      %37 = vector.load %arg9[%c0_22, %c0_23] : memref<8x128xf32, #tpu.memory_space<vmem>>, vector<8x128xf32>
      tpu.vector_store %arg9[%c0_22, %c0_23], %36 {strides = array<i32>} : memref<8x128xf32, #tpu.memory_space<vmem>>, vector<8x128xf32>,
    } else {
    }
    %c0_14 = arith.constant 0 : index
    %c0_15 = arith.constant 0 : index
    %26 = vector.load %arg4[%c0_14, %c0_15] : memref<1x128xi32, #tpu.memory_space<vmem>>, vector<1x128xi32>
    %27 = tpu.iota {dimensions = array<i32: 0>} : vector<8x128xi32>
    %28 = vector.broadcast %26 : vector<1x128xi32> to vector<8x128xi32>
    %29 = arith.cmpi eq, %28, %27 : vector<8x128xi32>
    %30 = arith.extui %29 : vector<8x128xi1> to vector<8x128xi32>
    %31 = arith.sitofp %30 : vector<8x128xi32> to vector<8x128xf32>
    %c0_16 = arith.constant 0 : index
    %c0_17 = arith.constant 0 : index
    %32 = vector.load %arg9[%c0_16, %c0_17] : memref<8x128xf32, #tpu.memory_space<vmem>>, vector<8x128xf32>
    %cst_18 = arith.constant dense<0.000000e+00> : vector<8x128xf32>
    %33 = tpu.matmul %31, %20, %cst_18 {dimension_numbers = #tpu.dot_dimension_numbers<[1], [0], [0], [1], [0, 0, 1, 1], [], []>} : vector<8x128xf32>, vector<128x128xf32>, vector<8x128xf32> -> vector<8x128xf32>
    %34 = arith.addf %32, %33 : vector<8x128xf32>
    %c0_19 = arith.constant 0 : index
    %c0_20 = arith.constant 0 : index
    %35 = vector.load %arg9[%c0_19, %c0_20] : memref<8x128xf32, #tpu.memory_space<vmem>>, vector<8x128xf32>
    tpu.vector_store %arg9[%c0_19, %c0_20], %34 {strides = array<i32>} : memref<8x128xf32, #tpu.memory_space<vmem>>, vector<8x128xf32>,
    return
  }
  func.func @transform_0(%arg0: i32, %arg1: i32) -> (i32, i32) {
    %c0_i32 = arith.constant 0 : i32
    %c0_i32_0 = arith.constant 0 : i32
    return %arg1, %c0_i32 : i32, i32
  }
  func.func @transform_1(%arg0: i32, %arg1: i32) -> (i32, i32) {
    %c0_i32 = arith.constant 0 : i32
    %c0_i32_0 = arith.constant 0 : i32
    return %arg1, %c0_i32 : i32, i32
  }
  func.func @transform_2(%arg0: i32, %arg1: i32) -> (i32, i32) {
    %c0_i32 = arith.constant 0 : i32
    %c0_i32_0 = arith.constant 0 : i32
    return %c0_i32, %arg1 : i32, i32
  }
  func.func @transform_3(%arg0: i32, %arg1: i32) -> (i32, i32) {
    %c0_i32 = arith.constant 0 : i32
    %c0_i32_0 = arith.constant 0 : i32
    return %c0_i32, %arg0 : i32, i32
  }
  func.func @transform_4(%arg0: i32, %arg1: i32) -> (i32, i32) {
    %c0_i32 = arith.constant 0 : i32
    %c0_i32_0 = arith.constant 0 : i32
    return %c0_i32, %arg0 : i32, i32
  }
  func.func @transform_5(%arg0: i32, %arg1: i32) -> (i32, i32) {
    %c0_i32 = arith.constant 0 : i32
    %c0_i32_0 = arith.constant 0 : i32
    return %c0_i32, %arg0 : i32, i32
  }
  func.func @transform_6(%arg0: i32, %arg1: i32) -> (i32, i32) {
    %c0_i32 = arith.constant 0 : i32
    return %arg1, %arg0 : i32, i32
  }
  func.func @transform_7(%arg0: i32, %arg1: i32) -> (i32, i32) {
    %c0_i32 = arith.constant 0 : i32
    %c0_i32_0 = arith.constant 0 : i32
    return %c0_i32, %arg0 : i32, i32
  }
}

module attributes {stable_mosaic.version = 11 : i64} {
  func.func @prediction_mlp_kernel(%arg0: memref<8x128xf32, #tpu.memory_space<vmem>>, %arg1: memref<128x128xf32, #tpu.memory_space<vmem>>, %arg2: memref<1x128xf32, #tpu.memory_space<vmem>>, %arg3: memref<128x128xf32, #tpu.memory_space<vmem>>, %arg4: memref<1x128xf32, #tpu.memory_space<vmem>>, %arg5: memref<8x128xf32, #tpu.memory_space<vmem>>) attributes {dimension_semantics = [], scalar_prefetch = 0 : i64, scratch_operands = 0 : i64, tpu.core_type = #tpu.core_type<tc>} {
    %c0 = arith.constant 0 : index
    %c0_0 = arith.constant 0 : index
    %0 = vector.load %arg0[%c0, %c0_0] : memref<8x128xf32, #tpu.memory_space<vmem>>, vector<8x128xf32>
    %c0_1 = arith.constant 0 : index
    %c0_2 = arith.constant 0 : index
    %1 = vector.load %arg1[%c0_1, %c0_2] : memref<128x128xf32, #tpu.memory_space<vmem>>, vector<128x128xf32>
    %cst = arith.constant dense<0.000000e+00> : vector<8x128xf32>
    %2 = tpu.matmul %0, %1, %cst {dimension_numbers = #tpu.dot_dimension_numbers<[1], [0], [0], [1], [0, 0, 1, 1], [], []>} : vector<8x128xf32>, vector<128x128xf32>, vector<8x128xf32> -> vector<8x128xf32>
    %c0_3 = arith.constant 0 : index
    %c0_4 = arith.constant 0 : index
    %3 = vector.load %arg2[%c0_3, %c0_4] : memref<1x128xf32, #tpu.memory_space<vmem>>, vector<1x128xf32>
    %4 = vector.broadcast %3 : vector<1x128xf32> to vector<8x128xf32>
    %5 = arith.addf %2, %4 : vector<8x128xf32>
    %cst_5 = arith.constant 0.000000e+00 : f32
    %6 = vector.broadcast %cst_5 : f32 to vector<8x128xf32>
    %7 = arith.maximumf %5, %6 : vector<8x128xf32>
    %c0_6 = arith.constant 0 : index
    %c0_7 = arith.constant 0 : index
    %8 = vector.load %arg3[%c0_6, %c0_7] : memref<128x128xf32, #tpu.memory_space<vmem>>, vector<128x128xf32>
    %cst_8 = arith.constant dense<0.000000e+00> : vector<8x128xf32>
    %9 = tpu.matmul %7, %8, %cst_8 {dimension_numbers = #tpu.dot_dimension_numbers<[1], [0], [0], [1], [0, 0, 1, 1], [], []>} : vector<8x128xf32>, vector<128x128xf32>, vector<8x128xf32> -> vector<8x128xf32>
    %c0_9 = arith.constant 0 : index
    %c0_10 = arith.constant 0 : index
    %10 = vector.load %arg4[%c0_9, %c0_10] : memref<1x128xf32, #tpu.memory_space<vmem>>, vector<1x128xf32>
    %11 = vector.broadcast %10 : vector<1x128xf32> to vector<8x128xf32>
    %12 = arith.addf %9, %11 : vector<8x128xf32>
    %c0_11 = arith.constant 0 : index
    %c0_12 = arith.constant 0 : index
    %13 = vector.load %arg5[%c0_11, %c0_12] : memref<8x128xf32, #tpu.memory_space<vmem>>, vector<8x128xf32>
    tpu.vector_store %arg5[%c0_11, %c0_12], %12 {strides = array<i32>} : memref<8x128xf32, #tpu.memory_space<vmem>>, vector<8x128xf32>,
    return
  }
}

</mosaic_0001>

<bundles_post_ra>
// kernel: molecule_prediction_forward.2
= control target key start
LH: loop header
LB: loop body
LE: loop exit
PB: predicated region body
PF: predicated region fallthrough
CT: control target
= control target key end

     0   :  { %s1920_s24 = smov 0   ;;  %s1922_s25 = smov 0   ;;  %s2221_s0 = inlined_call_operand.vmem [shape: s32[256,1], index: 0, kind: input, shape index: {}]   ;;  %s2222_s1 = inlined_call_operand.vmem [shape: f32[256,9], index: 1, kind: input, shape index: {}]   ;;  %s2223_s2 = inlined_call_operand.vmem [shape: s32[1,256], index: 2, kind: input, shape index: {}]   ;;  %s2224_s3 = inlined_call_operand.vmem [shape: f32[16,128], index: 3, kind: input, shape index: {}]   ;;  %s2225_s4 = inlined_call_operand.vmem [shape: f32[9,128], index: 4, kind: input, shape index: {}]   ;;  %s2226_s5 = inlined_call_operand.vmem [shape: f32[1,128], index: 5, kind: input, shape index: {}]   ;;  %s2227_s6 = inlined_call_operand.vmem [shape: bf16[256,128], index: 6, kind: output, shape index: {0}]   ;;  %s2228_s7 = inlined_call_operand.vmem [shape: f32[8,128], index: 7, kind: output, shape index: {1}]  }
   0x1   :  { %s1924_s26 = smov 0  }
   0x2 LB: > { %s27_s27 = sadd.s32 1, %s1867_s25  ;;  %p1399_p0 = scmp.ge.s32.totalorder %s1871_s26, 1  ;;  %s1871_s26 = sphi %s1924_s26, %s18_s26   ;;  %s1867_s25 = sphi %s1922_s25, %s2230_s25   ;;  %s1863_s24 = sphi %s1920_s24, %s2229_s24  }
   0x3   : > { %p28_p1 = scmp.ge.s32.totalorder %s27_s27, 2  ;;  %p300_p2 = scmp.lt.s32.totalorder %s1871_s26, 3 }
   0x5   : > { %s2232_s27 = smov (%p28_p1, %s27_s27), 0  ;;  %p301_p3 = pnand %p1399_p0, %p300_p2 }
   0x6   : > { %s1400_s28 = sshll.u32 (!%p301_p3), %s1863_s24, 4  ;;  %v1873_v0 = vmov (!%p301_p3), 0   ;;  %v527_v1 = vld [vmem:[%s2225_s4] sm:$0xff] (!%p301_p3)  ;;  %v528_v2 = vld [vmem:[%s2225_s4 + $0x8] sm:$0x1] (!%p301_p3)  ;;  %vm774_vm0 = vcmask (!%p301_p3), 1040384   ;;  %v413_v39 = vlaneseq (!%p301_p3) }
   0x7   : > { %304 = sbr.rel (%p301_p3) target bundleno = 678 (0x2a6), region = 44  ;;  %1784 = vset.pattern.permute.xlu1 (!%p301_p3), %v1873_v0  ;;  %1783 = vset.pattern.permute.xlu0 (!%p301_p3), %v1873_v0  ;;  %p359_p4 = scmp.lt.s32.totalorder (!%p301_p3), %s1400_s28, 31  ;;  %v1706_v7 = vpack.c.bf16 (!%p301_p3), %v528_v2, %v527_v1  ;;  %vm725_vm1 = vcmask (!%p301_p3), 72704   ;;  %vm1874_vm2 = vmmov (!%p301_p3), 1   ;;  %v529_v9 = vld [vmem:[%s2224_s3] sm:$0xff] (!%p301_p3)  ;;  %v530_v11 = vld [vmem:[%s2224_s3 + $0x8] sm:$0xff] (!%p301_p3) }
   0x8   : > { %p370_p5 = scmp.lt.s32.totalorder (!%p301_p3), %s1863_s24, 1  ;;  %vm1707_vm3 = vmpackc.low (!%p301_p3), %vm774_vm0, %vm1874_vm2  ;;  %v1702_v13 = vpack.c.bf16 (!%p301_p3), %v530_v11, %v529_v9  ;;  %v2023_v40 = vand.u32 (!%p301_p3), 127, %v413_v39  ;;  %vm531_vm4 = vcmask (!%p301_p3), 130048   ;;  %v1875_v43 = vmov (!%p301_p3), 0.0   ;;  %p1488_p6 = scmp.ne.s32.totalorder (!%p301_p3), %s1863_s24, 0 }
   0x9   : > { %1708 = vmatprep.subr.msk.bf16.mxu0 (!%p301_p3), %vm1707_vm3, %v1706_v7 }
   0xa   : > { %1711 = vmatpush3.bf16.msk.msra.mxu0 (!%p301_p3), %vm1707_vm3, %v1706_v7  ;;  %1703 = vmatprep.subr.bf16.mxu1 (!%p301_p3), %v1702_v13 }
   0xb   : > { %1705 = vmatpush3.bf16.msra.mxu1 (!%p301_p3), %v1702_v13 }
   0xe   : > { %s2234_s28 = smov (!%p359_p4, %s1400_s28), 31 }
   0xf   : > { %s1401_s29 = sshll.u32 %s2234_s28, 3 }
  0x10   : > { %s1947_s9 = scalar_lea.vmem %s2221_s0, %s1401_s29  ;;  %s1963_s16 = scalar_lea.vmem %s2222_s1, %s1401_s29 }
  0x11   : > { %v399_v3 = vld [vmem:[%s1947_s9 + $0x10] sm:$0xff]  ;;  %v397_v4 = vld [vmem:[%s1947_s9] sm:$0xff]  ;;  %v400_v5 = vld [vmem:[%s1947_s9 + $0x18] sm:$0xff]  ;;  %s1966_s17 = scalar_select %p370_p5, %s1863_s24, 1 }
  0x12   : > { %422 = vperm.xlu1 %1784, %v399_v3   ;;  %416 = vperm.xlu0 %1783, %v397_v4   ;;  %v398_v6 = vld [vmem:[%s1947_s9 + $0x8] sm:$0xff]  ;;  %v401_v10 = vld [vmem:[%s1947_s9 + $0x20] sm:$0xff]  ;;  %v513_v15 = vld [vmem:[%s1963_s16 + $0x10] sm:$0xff] }
  0x13   : > { %v402_v8 = vld [vmem:[%s1947_s9 + $0x28] sm:$0xff]  ;;  %s372_s22 = scalar_lea.vmem %s2223_s2, %s1966_s17  ;;  %v511_v12 = vld [vmem:[%s1963_s16] sm:$0xff]  ;;  %v404_v16 = vld [vmem:[%s1947_s9 + $0x38] sm:$0xff] }
  0x14   : > { %1643 = vmatprep.mubr.msk.f32.mxu0 %vm725_vm1, %v511_v12  ;;  %v512_v14 = vld [vmem:[%s1963_s16 + $0x8] sm:$0xff]  ;;  %v403_v17 = vld [vmem:[%s1947_s9 + $0x30] sm:$0xff]  ;;  %v514_v18 = vld [vmem:[%s1963_s16 + $0x18] sm:$0xff] }
  0x15   : > { %1644 = vmatmul.mubr.msk.f32.vlgmr.msra.gmra.mrb[0].mxu0 %vm725_vm1, %v512_v14  ;;  %v515_v19 = vld [vmem:[%s1963_s16 + $0x20] sm:$0xff]  ;;  %v406_v20 = vld [vmem:[%s1947_s9 + $0x48] sm:$0xff]  ;;  %v517_v23 = vld [vmem:[%s1963_s16 + $0x30] sm:$0xff] }
  0x16   : > { %425 = vperm.xlu1 %1784, %v400_v5   ;;  %419 = vperm.xlu0 %1783, %v398_v6   ;;  %v405_v21 = vld [vmem:[%s1947_s9 + $0x40] sm:$0xff]  ;;  %v516_v22 = vld [vmem:[%s1963_s16 + $0x28] sm:$0xff]  ;;  %v408_v24 = vld [vmem:[%s1947_s9 + $0x58] sm:$0xff] }
  0x17   : > { %1646 = vmatprep.mubr.msk.f32.mxu0 %vm725_vm1, %v513_v15  ;;  %v407_v25 = vld [vmem:[%s1947_s9 + $0x50] sm:$0xff]  ;;  %v518_v26 = vld [vmem:[%s1963_s16 + $0x38] sm:$0xff]  ;;  %v519_v27 = vld [vmem:[%s1963_s16 + $0x40] sm:$0xff] }
  0x18   : > { %v410_v28 = vld [vmem:[%s1947_s9 + $0x68] sm:$0xff]  ;;  %v409_v29 = vld [vmem:[%s1947_s9 + $0x60] sm:$0xff]  ;;  %v521_v31 = vld [vmem:[%s1963_s16 + $0x50] sm:$0xff] }
  0x19   : > { %1647 = vmatmul.mubr.msk.f32.gmra.mrb[2].mxu0 %vm725_vm1, %v514_v18  ;;  %v520_v30 = vld [vmem:[%s1963_s16 + $0x48] sm:$0xff]  ;;  %v412_v32 = vld [vmem:[%s1947_s9 + $0x78] sm:$0xff]  ;;  %v411_v33 = vld [vmem:[%s1947_s9 + $0x70] sm:$0xff]  ;;  %s1405_s9 = sshll.u32 %s2234_s28, 2 }
  0x1a   : > { %431 = vperm.xlu1 %1784, %v402_v8   ;;  %428 = vperm.xlu0 %1783, %v401_v10   ;;  %v522_v34 = vld [vmem:[%s1963_s16 + $0x58] sm:$0xff]  ;;  %v523_v35 = vld [vmem:[%s1963_s16 + $0x60] sm:$0xff]  ;;  %v524_v36 = vld [vmem:[%s1963_s16 + $0x68] sm:$0xff]  ;;  %s2161_s11 = scalar_lea.vmem %s2227_s6, %s1405_s9 }
  0x1b   : > { %1649 = vmatprep.mubr.msk.f32.mxu0 %vm725_vm1, %v515_v19  ;;  %v525_v37 = vld [vmem:[%s1963_s16 + $0x70] sm:$0xff]  ;;  %v526_v38 = vld [vmem:[%s1963_s16 + $0x78] sm:$0xff] }
  0x1d   : > { %1650 = vmatmul.mubr.msk.f32.gmra.mrb[4].mxu0 %vm725_vm1, %v516_v22 }
  0x1e   : > { %437 = vperm.xlu1 %1784, %v404_v16   ;;  %434 = vperm.xlu0 %1783, %v403_v17  }
  0x1f   : > { %1652 = vmatprep.mubr.msk.f32.mxu0 %vm725_vm1, %v517_v23 }
  0x21   : > { %1653 = vmatmul.mubr.msk.f32.gmra.mrb[6].mxu0 %vm725_vm1, %v518_v26 }
  0x22   : > { %443 = vperm.xlu1 %1784, %v406_v20   ;;  %440 = vperm.xlu0 %1783, %v405_v21  }
  0x23   : > { %1655 = vmatprep.mubr.msk.f32.mxu0 %vm725_vm1, %v519_v27  ;;  %v2086_v27 = vld [vmem:[%s2226_s5] ss:$0 sm:$0xff] }
  0x25   : > { %1656 = vmatmul.mubr.msk.f32.gmra.mrb[8].mxu0 %vm725_vm1, %v520_v30 }
  0x26   : > { %449 = vperm.xlu1 %1784, %v408_v24   ;;  %446 = vperm.xlu0 %1783, %v407_v25  }
  0x27   : > { %1658 = vmatprep.mubr.msk.f32.mxu0 %vm725_vm1, %v521_v31 }
  0x29   : > { %1659 = vmatmul.mubr.msk.f32.gmra.mrb[10].mxu0 %vm725_vm1, %v522_v34 }
  0x2a   : > { %455 = vperm.xlu1 %1784, %v410_v28   ;;  %452 = vperm.xlu0 %1783, %v409_v29  }
  0x2b   : > { %1661 = vmatprep.mubr.msk.f32.mxu0 %vm725_vm1, %v523_v35 }
  0x2d   : > { %1662 = vmatmul.mubr.msk.f32.gmra.mrb[12].mxu0 %vm725_vm1, %v524_v36 }
  0x2e   : > { %461 = vperm.xlu1 %1784, %v412_v32   ;;  %458 = vperm.xlu0 %1783, %v411_v33  }
  0x2f   : > { %1664 = vmatprep.mubr.msk.f32.mxu0 %vm725_vm1, %v525_v37 }
  0x31   : > { %1665 = vmatmul.mubr.msk.f32.gmra.mrb[14].mxu0 %vm725_vm1, %v526_v38 }
  0x91   : > { %v423_v41 = vpop.permute.xlu1 %422  ;;  %v417_v42 = vpop.permute.xlu0 %416 }
  0x92   : > { %vm463_vm5 = vcmp.eq.s32.totalorder %v417_v42, %v2023_v40  ;;  %vm465_vm6 = vcmp.eq.s32.totalorder %v423_v41, %v2023_v40 }
  0x93   : > { %v1406_v44 = vsel %vm463_vm5, 1.0, %v1875_v43  ;;  %v1408_v47 = vsel %vm465_vm6, 1.0, %v1875_v43 }
  0x94   : > { %1615 = vmatprep.mubr.msk.f32.mxu1 %vm531_vm4, %v1406_v44 }
  0x95   : > { %v426_v45 = vpop.permute.xlu1 %425  ;;  %v420_v46 = vpop.permute.xlu0 %419 }
  0x96   : > { %vm464_vm7 = vcmp.eq.s32.totalorder %v420_v46, %v2023_v40  ;;  %vm466_vm8 = vcmp.eq.s32.totalorder %v426_v45, %v2023_v40 }
  0x97   : > { %v1407_v48 = vsel %vm464_vm7, 1.0, %v1875_v43  ;;  %v1409_v51 = vsel %vm466_vm8, 1.0, %v1875_v43 }
  0x98   : > { %1616 = vmatmul.mubr.msk.f32.vlgmr.msra.gmra.mrb[0].mxu1 %vm531_vm4, %v1407_v48 }
  0x99   : > { %v432_v49 = vpop.permute.xlu1 %431  ;;  %1618 = vmatprep.mubr.msk.f32.mxu1 %vm531_vm4, %v1408_v47  ;;  %v429_v50 = vpop.permute.xlu0 %428 }
  0x9a   : > { %vm467_vm9 = vcmp.eq.s32.totalorder %v429_v50, %v2023_v40  ;;  %vm468_vm10 = vcmp.eq.s32.totalorder %v432_v49, %v2023_v40 }
  0x9b   : > { %v1410_v52 = vsel %vm467_vm9, 1.0, %v1875_v43  ;;  %v1411_v55 = vsel %vm468_vm10, 1.0, %v1875_v43 }
  0x9c   : > { %1619 = vmatmul.mubr.msk.f32.gmra.mrb[2].mxu1 %vm531_vm4, %v1409_v51 }
  0x9d   : > { %v438_v53 = vpop.permute.xlu1 %437  ;;  %1621 = vmatprep.mubr.msk.f32.mxu1 %vm531_vm4, %v1410_v52  ;;  %v435_v54 = vpop.permute.xlu0 %434 }
  0x9e   : > { %vm469_vm11 = vcmp.eq.s32.totalorder %v435_v54, %v2023_v40  ;;  %vm470_vm12 = vcmp.eq.s32.totalorder %v438_v53, %v2023_v40 }
  0x9f   : > { %v1412_v56 = vsel %vm469_vm11, 1.0, %v1875_v43  ;;  %v1413_v59 = vsel %vm470_vm12, 1.0, %v1875_v43 }
  0xa0   : > { %1622 = vmatmul.mubr.msk.f32.gmra.mrb[4].mxu1 %vm531_vm4, %v1411_v55 }
  0xa1   : > { %v444_v57 = vpop.permute.xlu1 %443  ;;  %1624 = vmatprep.mubr.msk.f32.mxu1 %vm531_vm4, %v1412_v56  ;;  %v441_v58 = vpop.permute.xlu0 %440 }
  0xa2   : > { %vm471_vm13 = vcmp.eq.s32.totalorder %v441_v58, %v2023_v40  ;;  %vm472_vm14 = vcmp.eq.s32.totalorder %v444_v57, %v2023_v40 }
  0xa3   : > { %v1414_v60 = vsel %vm471_vm13, 1.0, %v1875_v43  ;;  %v1415_v63 = vsel %vm472_vm14, 1.0, %v1875_v43 }
  0xa4   : > { %1625 = vmatmul.mubr.msk.f32.gmra.mrb[6].mxu1 %vm531_vm4, %v1413_v59 }
  0xa5   : > { %v450_v61 = vpop.permute.xlu1 %449  ;;  %1627 = vmatprep.mubr.msk.f32.mxu1 %vm531_vm4, %v1414_v60  ;;  %v447_v62 = vpop.permute.xlu0 %446 }
  0xa6   : > { %vm473_vm15 = vcmp.eq.s32.totalorder %v447_v62, %v2023_v40  ;;  %vm474_vm0 = vcmp.eq.s32.totalorder %v450_v61, %v2023_v40 }
  0xa7   : > { %v1416_v0 = vsel %vm473_vm15, 1.0, %v1875_v43  ;;  %v1417_v3 = vsel %vm474_vm0, 1.0, %v1875_v43 }
  0xa8   : > { %1628 = vmatmul.mubr.msk.f32.gmra.mrb[8].mxu1 %vm531_vm4, %v1415_v63 }
  0xa9   : > { %v456_v1 = vpop.permute.xlu1 %455  ;;  %1630 = vmatprep.mubr.msk.f32.mxu1 %vm531_vm4, %v1416_v0  ;;  %v453_v2 = vpop.permute.xlu0 %452 }
  0xaa   : > { %vm475_vm1 = vcmp.eq.s32.totalorder %v453_v2, %v2023_v40  ;;  %vm476_vm2 = vcmp.eq.s32.totalorder %v456_v1, %v2023_v40 }
  0xab   : > { %v1418_v4 = vsel %vm475_vm1, 1.0, %v1875_v43  ;;  %v1419_v7 = vsel %vm476_vm2, 1.0, %v1875_v43 }
  0xac   : > { %1631 = vmatmul.mubr.msk.f32.gmra.mrb[10].mxu1 %vm531_vm4, %v1417_v3 }
  0xad   : > { %v462_v5 = vpop.permute.xlu1 %461  ;;  %1633 = vmatprep.mubr.msk.f32.mxu1 %vm531_vm4, %v1418_v4  ;;  %v459_v6 = vpop.permute.xlu0 %458 }
  0xae   : > { %vm477_vm3 = vcmp.eq.s32.totalorder %v459_v6, %v2023_v40  ;;  %vm478_vm5 = vcmp.eq.s32.totalorder %v462_v5, %v2023_v40 }
  0xaf   : > { %v1420_v8 = vsel %vm477_vm3, 1.0, %v1875_v43  ;;  %v1421_v9 = vsel %vm478_vm5, 1.0, %v1875_v43 }
  0xb0   : > { %1634 = vmatmul.mubr.msk.f32.gmra.mrb[12].mxu1 %vm531_vm4, %v1419_v7 }
  0xb1   : > { %1636 = vmatprep.mubr.msk.f32.mxu1 %vm531_vm4, %v1420_v8 }
  0xb4   : > { %1637 = vmatmul.mubr.msk.f32.gmra.mrb[14].mxu1 %vm531_vm4, %v1421_v9 }
  0xe8   : > { %v1645_v10 = vpop.f32.mrb[0].mxu0 }
  0xe9   : > { %v844_v11 = vpop.f32.mrb[1].mxu0 }
  0xec   : > { %v1648_v12 = vpop.f32.mrb[2].mxu0 }
  0xed   : > { %v854_v13 = vpop.f32.mrb[3].mxu0 }
  0xf0   : > { %v1651_v14 = vpop.f32.mrb[4].mxu0 }
  0xf1   : > { %v864_v15 = vpop.f32.mrb[5].mxu0 }
  0xf4   : > { %v1654_v16 = vpop.f32.mrb[6].mxu0 }
  0xf5   : > { %v874_v17 = vpop.f32.mrb[7].mxu0 }
  0xf8   : > { %v1657_v18 = vpop.f32.mrb[8].mxu0 }
  0xf9   : > { %v884_v19 = vpop.f32.mrb[9].mxu0 }
  0xfc   : > { %v1660_v20 = vpop.f32.mrb[10].mxu0 }
  0xfd   : > { %v2073_v21 = vpop.f32.mrb[11].mxu0 }
 0x100   : > { %v2075_v22 = vpop.f32.mrb[12].mxu0 }
 0x101   : > { %v2077_v23 = vpop.f32.mrb[13].mxu0 }
 0x104   : > { %v2079_v24 = vpop.f32.mrb[14].mxu0 }
 0x105   : > { %v2081_v25 = vpop.f32.mrb[15].mxu0 }
 0x16b   : > { %v1617_v26 = vpop.f32.mrb[0].mxu1 }
 0x16c   : > { %v850_v28 = vadd.f32 %v1645_v10, %v1617_v26  ;;  %v646_v29 = vpop.f32.mrb[1].mxu1 }
 0x16d   : > { %v845_v30 = vadd.f32 %v844_v11, %v646_v29 }
 0x16e   : > { %v2089_v31 = vadd.f32 %v2086_v27, %v850_v28 }
 0x16f   : > { %v2092_v32 = vadd.f32 %v2086_v27, %v845_v30  ;;  %v1620_v33 = vpop.f32.mrb[2].mxu1 }
 0x170   : > { %v1457_v34 = vmul.f32 -1.442695, %v2089_v31  ;;  %v860_v35 = vadd.f32 %v1648_v12, %v1620_v33  ;;  %v656_v36 = vpop.f32.mrb[3].mxu1 }
 0x171   : > { %v1456_v37 = vmul.f32 -1.442695, %v2092_v32  ;;  %v855_v38 = vadd.f32 %v854_v13, %v656_v36 }
 0x172   : > { %1785 = vpow2.f32 %v1457_v34  ;;  %v2097_v40 = vadd.f32 %v2086_v27, %v860_v35 }
 0x173   : > { %1787 = vpow2.f32 %v1456_v37  ;;  %v2100_v41 = vadd.f32 %v2086_v27, %v855_v38  ;;  %v1623_v42 = vpop.f32.mrb[4].mxu1 }
 0x174   : > { %v1459_v44 = vmul.f32 -1.442695, %v2097_v40  ;;  %v870_v45 = vadd.f32 %v1651_v14, %v1623_v42  ;;  %v666_v46 = vpop.f32.mrb[5].mxu1 }
 0x175   : > { %v1458_v47 = vmul.f32 -1.442695, %v2100_v41  ;;  %v865_v48 = vadd.f32 %v864_v15, %v666_v46 }
 0x176   : > { %1789 = vpow2.f32 %v1459_v44  ;;  %v2105_v49 = vadd.f32 %v2086_v27, %v870_v45 }
 0x177   : > { %1791 = vpow2.f32 %v1458_v47  ;;  %v2108_v50 = vadd.f32 %v2086_v27, %v865_v48  ;;  %v1626_v51 = vpop.f32.mrb[6].mxu1 }
 0x178   : > { %v1461_v52 = vmul.f32 -1.442695, %v2105_v49  ;;  %v880_v53 = vadd.f32 %v1654_v16, %v1626_v51  ;;  %v676_v54 = vpop.f32.mrb[7].mxu1 }
 0x179   : > { %v1460_v55 = vmul.f32 -1.442695, %v2108_v50  ;;  %v875_v56 = vadd.f32 %v874_v17, %v676_v54 }
 0x17a   : > { %1793 = vpow2.f32 %v1461_v52  ;;  %v2113_v57 = vadd.f32 %v2086_v27, %v880_v53 }
 0x17b   : > { %1795 = vpow2.f32 %v1460_v55  ;;  %v2116_v58 = vadd.f32 %v2086_v27, %v875_v56  ;;  %v1629_v59 = vpop.f32.mrb[8].mxu1 }
 0x17c   : > { %v1786_v60 = vpop.eup %1785  ;;  %v1463_v61 = vmul.f32 -1.442695, %v2113_v57  ;;  %v890_v62 = vadd.f32 %v1657_v18, %v1629_v59  ;;  %v686_v63 = vpop.f32.mrb[9].mxu1 }
 0x17d   : > { %v1788_v0 = vpop.eup %1787  ;;  %v995_v1 = vadd.f32 1.0, %v1786_v60  ;;  %v1462_v2 = vmul.f32 -1.442695, %v2116_v58  ;;  %v885_v3 = vadd.f32 %v884_v19, %v686_v63 }
 0x17e   : > { %v994_v4 = vadd.f32 1.0, %v1788_v0  ;;  %1797 = vpow2.f32 %v1463_v61  ;;  %v2121_v5 = vadd.f32 %v2086_v27, %v890_v62 }
 0x17f   : > { %1799 = vrcp.f32 %v995_v1  ;;  %v2124_v6 = vadd.f32 %v2086_v27, %v885_v3  ;;  %v1632_v7 = vpop.f32.mrb[10].mxu1 }
 0x180   : > { %v1790_v8 = vpop.eup %1789  ;;  %1801 = vrcp.f32 %v994_v4  ;;  %v1465_v9 = vmul.f32 -1.442695, %v2121_v5  ;;  %v900_v10 = vadd.f32 %v1660_v20, %v1632_v7  ;;  %v696_v11 = vpop.f32.mrb[11].mxu1 }
 0x181   : > { %v1792_v12 = vpop.eup %1791  ;;  %v997_v13 = vadd.f32 1.0, %v1790_v8  ;;  %1803 = vpow2.f32 %v1462_v2  ;;  %v1464_v14 = vmul.f32 -1.442695, %v2124_v6  ;;  %v895_v15 = vadd.f32 %v2073_v21, %v696_v11 }
 0x182   : > { %v996_v16 = vadd.f32 1.0, %v1792_v12  ;;  %1805 = vpow2.f32 %v1465_v9  ;;  %v2130_v17 = vadd.f32 %v2086_v27, %v900_v10 }
 0x183   : > { %1807 = vrcp.f32 %v997_v13  ;;  %v2133_v18 = vadd.f32 %v2086_v27, %v895_v15  ;;  %v1635_v19 = vpop.f32.mrb[12].mxu1 }
 0x184   : > { %v1794_v26 = vpop.eup %1793  ;;  %1809 = vrcp.f32 %v996_v16  ;;  %v1467_v20 = vmul.f32 -1.442695, %v2130_v17  ;;  %v910_v28 = vadd.f32 %v2075_v22, %v1635_v19  ;;  %v706_v29 = vpop.f32.mrb[13].mxu1 }
 0x185   : > { %v1796_v30 = vpop.eup %1795  ;;  %v999_v33 = vadd.f32 1.0, %v1794_v26  ;;  %1811 = vpow2.f32 %v1464_v14  ;;  %v1466_v21 = vmul.f32 -1.442695, %v2133_v18  ;;  %v905_v34 = vadd.f32 %v2077_v23, %v706_v29 }
 0x186   : > { %v998_v35 = vadd.f32 1.0, %v1796_v30  ;;  %1813 = vpow2.f32 %v1467_v20  ;;  %v2140_v36 = vadd.f32 %v2086_v27, %v910_v28 }
 0x187   : > { %1815 = vrcp.f32 %v999_v33  ;;  %v2143_v37 = vadd.f32 %v2086_v27, %v905_v34  ;;  %v1638_v38 = vpop.f32.mrb[14].mxu1 }
 0x188   : > { %v1798_v22 = vpop.eup %1797  ;;  %1817 = vrcp.f32 %v998_v35  ;;  %v1469_v42 = vmul.f32 -1.442695, %v2140_v36  ;;  %v920_v44 = vadd.f32 %v2079_v24, %v1638_v38  ;;  %v716_v45 = vpop.f32.mrb[15].mxu1 }
 0x189   : > { %v1800_v46 = vpop.eup %1799  ;;  %v1001_v23 = vadd.f32 1.0, %v1798_v22  ;;  %1819 = vpow2.f32 %v1466_v21  ;;  %v1468_v47 = vmul.f32 -1.442695, %v2143_v37  ;;  %v915_v48 = vadd.f32 %v2081_v25, %v716_v45 }
 0x18a   : > { %v1802_v51 = vpop.eup %1801  ;;  %v1043_v52 = vmul.f32 %v1800_v46, %v2089_v31  ;;  %1821 = vpow2.f32 %v1469_v42  ;;  %v2152_v53 = vadd.f32 %v2086_v27, %v920_v44 }
 0x18b   : > { %v1804_v54 = vpop.eup %1803  ;;  %v1042_v55 = vmul.f32 %v1802_v51, %v2092_v32  ;;  %1823 = vrcp.f32 %v1001_v23  ;;  %v2156_v24 = vadd.f32 %v2086_v27, %v915_v48 }
 0x18c   : > { %v1806_v56 = vpop.eup %1805  ;;  %v1000_v25 = vadd.f32 1.0, %v1804_v54  ;;  %1825 = vpow2.f32 %v1468_v47  ;;  %v1471_v31 = vmul.f32 -1.442695, %v2152_v53 }
 0x18d   : > { %v1808_v59 = vpop.eup %1807  ;;  %v2164_v60 = vpack.c.bf16 %v1043_v52, %v1042_v55  ;;  %v1003_v61 = vadd.f32 1.0, %v1806_v56  ;;  %v1470_v32 = vmul.f32 -1.442695, %v2156_v24 }
 0x18e   : > { %v1810_v62 = vpop.eup %1809  ;;  %v1045_v27 = vmul.f32 %v1808_v59, %v2097_v40  ;;  %1827 = vrcp.f32 %v1000_v25 }
 0x18f   : > { %v1812_v63 = vpop.eup %1811  ;;  %1515 = vst [vmem:[%s2161_s11] sm:$0xff] %v2164_v60   ;;  %v1044_v0 = vmul.f32 %v1810_v62, %v2100_v41  ;;  %1829 = vrcp.f32 %v1003_v61 }
 0x190   : > { %v1814_v1 = vpop.eup %1813  ;;  %v1002_v2 = vadd.f32 1.0, %v1812_v63  ;;  %1831 = vpow2.f32 %v1471_v31 }
 0x191   : > { %v1816_v3 = vpop.eup %1815  ;;  %v2171_v4 = vpack.c.bf16 %v1045_v27, %v1044_v0  ;;  %v1005_v7 = vadd.f32 1.0, %v1814_v1  ;;  %1833 = vpow2.f32 %v1470_v32 }
 0x192   : > { %v1818_v8 = vpop.eup %1817  ;;  %v1047_v40 = vmul.f32 %v1816_v3, %v2105_v49  ;;  %1835 = vrcp.f32 %v1002_v2 }
 0x193   : > { %v1820_v9 = vpop.eup %1819  ;;  %1551 = vst [vmem:[%s2161_s11 + $0x8] sm:$0xff] %v2171_v4   ;;  %v1046_v10 = vmul.f32 %v1818_v8, %v2108_v50  ;;  %1837 = vrcp.f32 %v1005_v7 }
 0x194   : > { %v1822_v41 = vpop.eup %1821  ;;  %v1004_v11 = vadd.f32 1.0, %v1820_v9 }
 0x195   : > { %v1824_v12 = vpop.eup %1823  ;;  %v1524_v13 = vpack.c.bf16 %v1047_v40, %v1046_v10  ;;  %v1007_v14 = vadd.f32 1.0, %v1822_v41 }
 0x196   : > { %v1826_v15 = vpop.eup %1825  ;;  %1839 = vrcp.f32 %v1004_v11  ;;  %v1049_v16 = vmul.f32 %v1824_v12, %v2113_v57 }
 0x197   : > { %1552 = vst [vmem:[%s2161_s11 + $0x10] sm:$0xff] %v1524_v13   ;;  %1841 = vrcp.f32 %v1007_v14  ;;  %v1006_v49 = vadd.f32 1.0, %v1826_v15 }
 0x198   : > { %v1828_v19 = vpop.eup %1827 }
 0x199   : > { %v1830_v26 = vpop.eup %1829  ;;  %v1048_v20 = vmul.f32 %v1828_v19, %v2116_v58  ;;  %1843 = vrcp.f32 %v1006_v49 }
 0x19a   : > { %v1832_v50 = vpop.eup %1831  ;;  %v1051_v30 = vmul.f32 %v1830_v26, %v2121_v5 }
 0x19b   : > { %v1834_v28 = vpop.eup %1833  ;;  %v1529_v29 = vpack.c.bf16 %v1049_v16, %v1048_v20  ;;  %v1009_v33 = vadd.f32 1.0, %v1832_v50 }
 0x19c   : > { %v1836_v21 = vpop.eup %1835  ;;  %v1008_v34 = vadd.f32 1.0, %v1834_v28 }
 0x19d   : > { %v1838_v35 = vpop.eup %1837  ;;  %1553 = vst [vmem:[%s2161_s11 + $0x18] sm:$0xff] %v1529_v29   ;;  %v1050_v57 = vmul.f32 %v1836_v21, %v2124_v6  ;;  %1845 = vrcp.f32 %v1009_v33 }
 0x19e   : > { %1847 = vrcp.f32 %v1008_v34  ;;  %v1053_v58 = vmul.f32 %v1838_v35, %v2130_v17 }
 0x19f   : > { %v1534_v38 = vpack.c.bf16 %v1051_v30, %v1050_v57 }
 0x1a0   : > { %v1840_v22 = vpop.eup %1839 }
 0x1a1   : > { %v1842_v42 = vpop.eup %1841  ;;  %1554 = vst [vmem:[%s2161_s11 + $0x20] sm:$0xff] %v1534_v38   ;;  %v1052_v5 = vmul.f32 %v1840_v22, %v2133_v18  ;;  %v1876_v18 = vmov (!%p1488_p6), 0.0  }
 0x1a2   : > { %v1055_v44 = vmul.f32 %v1842_v42, %v2140_v36  ;;  %1142 = vst [vmem:[%s2228_s7] sm:$0xff] (!%p1488_p6), %v1876_v18 }
 0x1a3   : > { %v1844_v45 = vpop.eup %1843  ;;  %v1539_v46 = vpack.c.bf16 %v1053_v58, %v1052_v5 }
 0x1a4   : > { %v1054_v23 = vmul.f32 %v1844_v45, %v2143_v37 }
 0x1a5   : > { %1555 = vst [vmem:[%s2161_s11 + $0x28] sm:$0xff] %v1539_v46  }
 0x1a6   : > { %v1544_v6 = vpack.c.bf16 %v1055_v44, %v1054_v23 }
 0x1a7   : > { %v1846_v47 = vpop.eup %1845  ;;  %1141 = sbr.rel (%p1488_p6) target bundleno = 430 (0x1ae), region = 48 }
 0x1a8   : > { %v1848_v48 = vpop.eup %1847  ;;  %1556 = vst [vmem:[%s2161_s11 + $0x30] sm:$0xff] %v1544_v6   ;;  %v1057_v51 = vmul.f32 %v1846_v47, %v2152_v53 }
 0x1a9   : > { %v1056_v17 = vmul.f32 %v1848_v48, %v2156_v24 }
 0x1ab   : > { %v1549_v52 = vpack.c.bf16 %v1057_v51, %v1056_v17 }
 0x1ad   : > { %1557 = vst [vmem:[%s2161_s11 + $0x38] sm:$0xff] %v1549_v52  }
 0x1ae PF: > { %v1877_v36 = vmov 0.0|0.0   ;;  %vm1878_vm4 = vmmov 0   ;;  %v1145_v37 = vshrl.u32 %v413_v39, 7  ;;  %v1879_v53 = vmov 1.0   ;;  %v1153_v54 = vld [vmem:[%s2228_s7] sm:$0xff] }
 0x1af   : > { %1712 = vmatprep.subr.bf16.mxu1 %v1877_v36  ;;  %1699 = vmatprep.mubr.msk.f32.mxu1 %vm1878_vm4, %v1875_v43  ;;  %v1489_v43 = vld [vmem:[%s372_s22] ss:$0 sm:$0xff] }
 0x1b0   : > { %1714 = vmatpush3.bf16.msra.mxu1 %v2164_v60  ;;  %vm1150_vm6 = vcmp.eq.s32.totalorder %v1489_v43, %v1145_v37 }
 0x1b1   : > { %1715 = vmatprep.subr.bf16.mxu1 %v1877_v36 }
 0x1b4   : > { %1717 = vmatpush3.bf16.msra.mxu1 %v2171_v4 }
 0x1b5   : > { %1718 = vmatprep.subr.bf16.mxu1 %v1877_v36 }
 0x1b8   : > { %1720 = vmatpush3.bf16.msra.mxu1 %v1524_v13 }
 0x1b9   : > { %1721 = vmatprep.subr.bf16.mxu1 %v1877_v36 }
 0x1bc   : > { %1723 = vmatpush3.bf16.msra.mxu1 %v1529_v29 }
 0x1bd   : > { %1724 = vmatprep.subr.bf16.mxu1 %v1877_v36 }
 0x1c0   : > { %1726 = vmatpush3.bf16.msra.mxu1 %v1534_v38 }
 0x1c1   : > { %1727 = vmatprep.subr.bf16.mxu1 %v1877_v36 }
 0x1c4   : > { %1729 = vmatpush3.bf16.msra.mxu1 %v1539_v46 }
 0x1c5   : > { %1730 = vmatprep.subr.bf16.mxu1 %v1877_v36 }
 0x1c8   : > { %1732 = vmatpush3.bf16.msra.mxu1 %v1544_v6 }
 0x1c9   : > { %1733 = vmatprep.subr.bf16.mxu1 %v1877_v36 }
 0x1cc   : > { %1735 = vmatpush3.bf16.msra.mxu1 %v1549_v52 }
 0x1cf   : > { %1700 = vmatmul.mubr.msk.f32.vlgmr.msra.gmra.mrb[16].mxu1 %vm1150_vm6, %v1879_v53 }
 0x2a2   : > { %v1220_v55 = vpop.f32.mrb[16].mxu1 }
 0x2a3   : > { %v1224_v24 = vadd.f32 %v1220_v55, %v1153_v54  ;;  %v1701_v56 = vpop.f32.mrb[17].mxu1 }
 0x2a5   : > { %1225 = vst [vmem:[%s2228_s7] sm:$0xff] %v1224_v24 }
 0x2a6 PF: > { %s18_s26 = sadd.s32 1, %s1871_s26   ;;  %s2229_s24 = smov %s1867_s25 }
 0x2a7   : > { %p15_p7 = scmp.ge.s32.totalorder %s18_s26, 4   ;;  %s2230_s25 = smov %s2232_s27 }
 0x2a9   :  { %17 = sbr.rel (!%p15_p7) target bundleno = 2 (0x2), region = 105 }

// kernel: molecule_prediction_forward.3
= control target key start
LH: loop header
LB: loop body
LE: loop exit
PB: predicated region body
PF: predicated region fallthrough
CT: control target
= control target key end

     0   :  { %v370_v0 = vmov 0.0|0.0   ;;  %vm371_vm0 = vmmov 0   ;;  %v372_v4 = vmov 0.0   ;;  %s527_s1 = inlined_call_operand.vmem [shape: f32[128,128], index: 1, kind: input, shape index: {}]   ;;  %s528_s3 = inlined_call_operand.vmem [shape: f32[128,128], index: 3, kind: input, shape index: {}]   ;;  %s529_s0 = inlined_call_operand.vmem [shape: f32[8,128], index: 0, kind: input, shape index: {}]   ;;  %s530_s2 = inlined_call_operand.vmem [shape: f32[1,128], index: 2, kind: input, shape index: {}]   ;;  %s531_s4 = inlined_call_operand.vmem [shape: f32[1,128], index: 4, kind: input, shape index: {}]   ;;  %s532_s5 = inlined_call_operand.vmem [shape: f32[8,128], index: 5, kind: output, shape index: {}]  }
   0x1   :  { %319 = vmatprep.subr.bf16.mxu0 %v370_v0  ;;  %v21_v1 = vld [vmem:[%s527_s1] sm:$0xff]  ;;  %v22_v2 = vld [vmem:[%s527_s1 + $0x8] sm:$0xff]  ;;  %v23_v3 = vld [vmem:[%s527_s1 + $0x10] sm:$0xff]  ;;  %281 = vmatprep.mubr.msk.f32.mxu0 %vm371_vm0, %v372_v4 }
   0x2   :  { %v320_v5 = vpack.c.bf16 %v22_v2, %v21_v1  ;;  %v24_v6 = vld [vmem:[%s527_s1 + $0x18] sm:$0xff]  ;;  %343 = vmatprep.subr.bf16.mxu1 %v370_v0  ;;  %316 = vmatprep.mubr.msk.f32.mxu1 %vm371_vm0, %v372_v4  ;;  %v25_v8 = vld [vmem:[%s527_s1 + $0x20] sm:$0xff]  ;;  %v26_v9 = vld [vmem:[%s527_s1 + $0x28] sm:$0xff] }
   0x3   :  { %v323_v7 = vpack.c.bf16 %v24_v6, %v23_v3  ;;  %v115_v10 = vld [vmem:[%s528_s3] sm:$0xff]  ;;  %v116_v11 = vld [vmem:[%s528_s3 + $0x8] sm:$0xff]  ;;  %v117_v12 = vld [vmem:[%s528_s3 + $0x10] sm:$0xff]  ;;  %v326_v14 = vpack.c.bf16 %v26_v9, %v25_v8 }
   0x4   :  { %321 = vmatpush3.bf16.msra.mxu0 %v320_v5  ;;  %v118_v13 = vld [vmem:[%s528_s3 + $0x18] sm:$0xff]  ;;  %v344_v15 = vpack.c.bf16 %v116_v11, %v115_v10  ;;  %v27_v16 = vld [vmem:[%s527_s1 + $0x30] sm:$0xff]  ;;  %v119_v19 = vld [vmem:[%s528_s3 + $0x20] sm:$0xff] }
   0x5   :  { %322 = vmatprep.subr.bf16.mxu0 %v370_v0  ;;  %v28_v17 = vld [vmem:[%s527_s1 + $0x38] sm:$0xff]  ;;  %v347_v18 = vpack.c.bf16 %v118_v13, %v117_v12  ;;  %v120_v20 = vld [vmem:[%s528_s3 + $0x28] sm:$0xff]  ;;  %v29_v22 = vld [vmem:[%s527_s1 + $0x40] sm:$0xff] }
   0x6   :  { %345 = vmatpush3.bf16.msra.mxu1 %v344_v15  ;;  %v329_v21 = vpack.c.bf16 %v28_v17, %v27_v16  ;;  %v30_v23 = vld [vmem:[%s527_s1 + $0x48] sm:$0xff]  ;;  %v350_v24 = vpack.c.bf16 %v120_v20, %v119_v19  ;;  %v121_v25 = vld [vmem:[%s528_s3 + $0x30] sm:$0xff]  ;;  %v122_v26 = vld [vmem:[%s528_s3 + $0x38] sm:$0xff] }
   0x7   :  { %346 = vmatprep.subr.bf16.mxu1 %v370_v0  ;;  %v332_v27 = vpack.c.bf16 %v30_v23, %v29_v22  ;;  %v31_v28 = vld [vmem:[%s527_s1 + $0x50] sm:$0xff]  ;;  %v32_v29 = vld [vmem:[%s527_s1 + $0x58] sm:$0xff]  ;;  %v353_v30 = vpack.c.bf16 %v122_v26, %v121_v25  ;;  %v123_v31 = vld [vmem:[%s528_s3 + $0x40] sm:$0xff] }
   0x8   :  { %324 = vmatpush3.bf16.msra.mxu0 %v323_v7  ;;  %v124_v32 = vld [vmem:[%s528_s3 + $0x48] sm:$0xff]  ;;  %v335_v33 = vpack.c.bf16 %v32_v29, %v31_v28  ;;  %v33_v34 = vld [vmem:[%s527_s1 + $0x60] sm:$0xff]  ;;  %v125_v37 = vld [vmem:[%s528_s3 + $0x50] sm:$0xff] }
   0x9   :  { %325 = vmatprep.subr.bf16.mxu0 %v370_v0  ;;  %v34_v35 = vld [vmem:[%s527_s1 + $0x68] sm:$0xff]  ;;  %v356_v36 = vpack.c.bf16 %v124_v32, %v123_v31  ;;  %v126_v38 = vld [vmem:[%s528_s3 + $0x58] sm:$0xff]  ;;  %v35_v40 = vld [vmem:[%s527_s1 + $0x70] sm:$0xff] }
   0xa   :  { %348 = vmatpush3.bf16.msra.mxu1 %v347_v18  ;;  %v338_v39 = vpack.c.bf16 %v34_v35, %v33_v34  ;;  %v36_v41 = vld [vmem:[%s527_s1 + $0x78] sm:$0xff]  ;;  %v359_v42 = vpack.c.bf16 %v126_v38, %v125_v37  ;;  %v127_v43 = vld [vmem:[%s528_s3 + $0x60] sm:$0xff]  ;;  %v128_v44 = vld [vmem:[%s528_s3 + $0x68] sm:$0xff] }
   0xb   :  { %349 = vmatprep.subr.bf16.mxu1 %v370_v0  ;;  %v341_v45 = vpack.c.bf16 %v36_v41, %v35_v40  ;;  %v362_v46 = vpack.c.bf16 %v128_v44, %v127_v43  ;;  %v20_v47 = vld [vmem:[%s529_s0] sm:$0xff]  ;;  %v129_v48 = vld [vmem:[%s528_s3 + $0x70] sm:$0xff]  ;;  %v130_v49 = vld [vmem:[%s528_s3 + $0x78] sm:$0xff] }
   0xc   :  { %327 = vmatpush3.bf16.msra.mxu0 %v326_v14  ;;  %v365_v50 = vpack.c.bf16 %v130_v49, %v129_v48  ;;  %v213_v51 = vld [vmem:[%s530_s2] ss:$0 sm:$0xff] }
   0xd   :  { %328 = vmatprep.subr.bf16.mxu0 %v370_v0  ;;  %v214_v56 = vld [vmem:[%s531_s4] ss:$0 sm:$0xff] }
   0xe   :  { %351 = vmatpush3.bf16.msra.mxu1 %v350_v24 }
   0xf   :  { %352 = vmatprep.subr.bf16.mxu1 %v370_v0 }
  0x10   :  { %330 = vmatpush3.bf16.msra.mxu0 %v329_v21 }
  0x11   :  { %331 = vmatprep.subr.bf16.mxu0 %v370_v0 }
  0x12   :  { %354 = vmatpush3.bf16.msra.mxu1 %v353_v30 }
  0x13   :  { %355 = vmatprep.subr.bf16.mxu1 %v370_v0 }
  0x14   :  { %333 = vmatpush3.bf16.msra.mxu0 %v332_v27 }
  0x15   :  { %334 = vmatprep.subr.bf16.mxu0 %v370_v0 }
  0x16   :  { %357 = vmatpush3.bf16.msra.mxu1 %v356_v36 }
  0x17   :  { %358 = vmatprep.subr.bf16.mxu1 %v370_v0 }
  0x18   :  { %336 = vmatpush3.bf16.msra.mxu0 %v335_v33 }
  0x19   :  { %337 = vmatprep.subr.bf16.mxu0 %v370_v0 }
  0x1a   :  { %360 = vmatpush3.bf16.msra.mxu1 %v359_v42 }
  0x1b   :  { %361 = vmatprep.subr.bf16.mxu1 %v370_v0 }
  0x1c   :  { %339 = vmatpush3.bf16.msra.mxu0 %v338_v39 }
  0x1d   :  { %340 = vmatprep.subr.bf16.mxu0 %v370_v0 }
  0x1e   :  { %363 = vmatpush3.bf16.msra.mxu1 %v362_v46 }
  0x1f   :  { %364 = vmatprep.subr.bf16.mxu1 %v370_v0 }
  0x20   :  { %342 = vmatpush3.bf16.msra.mxu0 %v341_v45 }
  0x22   :  { %366 = vmatpush3.bf16.msra.mxu1 %v365_v50 }
  0x23   :  { %282 = vmatmul.mubr.f32.vlgmr.msra.gmra.mrb[0].mxu0 %v20_v47 }
  0xf6   :  { %v110_v52 = vpop.f32.mrb[0].mxu0 }
  0xf7   :  { %v111_v53 = vadd.f32 %v213_v51, %v110_v52  ;;  %v283_v54 = vpop.f32.mrb[1].mxu0 }
  0xf9   :  { %v114_v55 = vmax.f32 %v111_v53, 0.0 }
  0xfb   :  { %317 = vmatmul.mubr.f32.vlgmr.msra.gmra.mrb[0].mxu1 %v114_v55 }
 0x1ce   :  { %v204_v57 = vpop.f32.mrb[0].mxu1 }
 0x1cf   :  { %v205_v58 = vadd.f32 %v214_v56, %v204_v57  ;;  %v318_v59 = vpop.f32.mrb[1].mxu1 }
 0x1d1   :  { %208 = vst [vmem:[%s532_s5] sm:$0xff] %v205_v58 }

</bundles_post_ra>
